<compile_context>
chip_gen: v7x
topology: tpu7x:2x2x1
jax: 0.10.0
libtpu: 0.0.40
codegen_flags: <defaults>
</compile_context>

<pallas_src>
import jax
import jax.numpy as jnp
from jax.experimental import pallas as pl
from jax.experimental.pallas import tpu as pltpu


def residual_layer_kernel(x_ref, w1_ref, b1_ref, w2_ref, b2_ref, o_ref):
    x = x_ref[...]                                            # (TB, W), input dtype
    # fc1: x @ W1 (weights already stored as (in, out)) + b1, then ReLU.
    h = jnp.dot(x, w1_ref[...], preferred_element_type=jnp.float32)
    h = jnp.maximum(h + b1_ref[...].astype(jnp.float32), 0.0)  # f32 epilogue
    # TODO(synk): training-mode dropout / BatchNorm not implemented (module defaults
    # are dropout=None, use_bn=False).
    # fc2: h @ W2 + b2, residual add, ReLU.
    out = jnp.dot(h.astype(w2_ref.dtype), w2_ref[...],
                  preferred_element_type=jnp.float32)
    out = jnp.maximum(out + b2_ref[...].astype(jnp.float32) + x.astype(jnp.float32),
                      0.0)
    o_ref[...] = out.astype(o_ref.dtype)


def _round_up(n, m):
    return ((n + m - 1) // m) * m


def _sublane_multiple(dtype):
    # Min sublane packing: 8 for f32, 16 for bf16, 32 for 8-bit dtypes.
    return max(8, 32 // jnp.dtype(dtype).itemsize)


def prepare_params(w1, b1, w2, b2, *, dtype=None):
    """One-time parameter setup (outside the hot path): transpose PyTorch-style
    (out, in) weights to (in, out); reshape biases to (1, W); optional dtype cast
    (e.g. bf16 for production)."""
    params = (w1.T, b1.reshape(1, -1), w2.T, b2.reshape(1, -1))
    if dtype is not None:
        params = tuple(p.astype(dtype) for p in params)
    return params


def residual_layer(x, w1_t, b1_2d, w2_t, b2_2d, *, block_b=512):
    """x: (B, W); w1_t/w2_t: (W, W) pre-transposed to (in, out); b*_2d: (1, W)."""
    B, W = x.shape
    sub = _sublane_multiple(x.dtype)

    # Batch tile: multiple of the sublane packing, capped at block_b and at the
    # (rounded) batch size.
    tb = max(sub, min(_round_up(block_b, sub), _round_up(B, sub)))
    # Guarantee >= 2 grid steps when possible (v7x: shard across both TensorCores;
    # all gens: keep DMA/compute overlap even when B <= block_b).
    if B > sub:
        tb = min(tb, _round_up(pl.cdiv(B, 2), sub))
    grid = (pl.cdiv(B, tb),)                      # partial last block is masked by Pallas

    x_bytes = jnp.dtype(x.dtype).itemsize
    w_bytes = jnp.dtype(w1_t.dtype).itemsize

    # Explicit VMEM budget: resident weights/biases (budgeted double-buffered),
    # double-buffered x/out tiles, and f32 intermediates; 2x headroom, capped at
    # 64 MiB (v7x physical VMEM per TensorCore).
    vmem_est = (2 * 2 * W * W * w_bytes           # W1/W2 resident
                + 2 * 2 * W * w_bytes             # b1/b2 resident
                + 2 * tb * W * x_bytes            # x tiles (double-buffered)
                + 2 * tb * W * x_bytes            # out tiles (double-buffered)
                + 4 * tb * W * 4)                 # f32 intermediates (h/out/residual)
    vmem_limit = int(min(max(2 * vmem_est, 32 * 1024 * 1024), 64 * 1024 * 1024))

    # Advisory cost hint for XLA scheduling around the custom call.
    cost = pl.CostEstimate(
        flops=2 * 2 * B * W * W,
        transcendentals=0,
        bytes_accessed=2 * B * W * x_bytes + 2 * W * W * w_bytes + 2 * W * w_bytes,
    )

    return pl.pallas_call(
        residual_layer_kernel,
        out_shape=jax.ShapeDtypeStruct((B, W), x.dtype),
        grid_spec=pltpu.PrefetchScalarGridSpec(
            num_scalar_prefetch=0,
            grid=grid,
            in_specs=[
                pl.BlockSpec((tb, W), lambda i: (i, 0)),   # x tile (streamed)
                pl.BlockSpec((W, W), lambda i: (0, 0)),    # W1 (resident)
                pl.BlockSpec((1, W), lambda i: (0, 0)),    # b1 (resident)
                pl.BlockSpec((W, W), lambda i: (0, 0)),    # W2 (resident)
                pl.BlockSpec((1, W), lambda i: (0, 0)),    # b2 (resident)
            ],
            out_specs=pl.BlockSpec((tb, W), lambda i: (i, 0)),
        ),
        compiler_params=pltpu.CompilerParams(
            dimension_semantics=("parallel",),
            vmem_limit_bytes=vmem_limit,
        ),
        cost_estimate=cost,
    )(x, w1_t, b1_2d, w2_t, b2_2d)


def residual_layer_ref(x, w1, b1, w2, b2):
    """Reference with PyTorch-style (out, in) weights."""
    h = jnp.maximum(x @ w1.T + b1, 0.0)
    return jnp.maximum(h @ w2.T + b2 + x, 0.0)


if __name__ == "__main__":
    key = jax.random.PRNGKey(0)
    # batch NOT a multiple of the tile -> exercises the pad-free masked partial block;
    # width multiple of 128 -> lane-dense stores, MXU-friendly.
    batch, width = 44, 128

    kx, kw1, kb1, kw2, kb2 = jax.random.split(key, 5)
    x = jax.random.normal(kx, (batch, width), dtype=jnp.float32)

    # Deterministic init mimicking nn.Linear default (uniform in +-1/sqrt(fan_in)).
    bound = 1.0 / (width ** 0.5)
    w1 = jax.random.uniform(kw1, (width, width), jnp.float32, -bound, bound)
    b1 = jax.random.uniform(kb1, (width,), jnp.float32, -bound, bound)
    w2 = jax.random.uniform(kw2, (width, width), jnp.float32, -bound, bound)
    b2 = jax.random.uniform(kb2, (width,), jnp.float32, -bound, bound)

    ref = residual_layer_ref(x, w1, b1, w2, b2)

    # --- f32 path (bit-for-bit check vs the PyTorch-equivalent reference) ---
    w1_t, b1_2d, w2_t, b2_2d = prepare_params(w1, b1, w2, b2)
    out = residual_layer(x, w1_t, b1_2d, w2_t, b2_2d)
    jax.block_until_ready(out)
    assert out.shape == (batch, width)
    assert jnp.allclose(out, ref, atol=1e-4, rtol=1e-4)

    # --- bf16 streamed-I/O path (production dtype: halves HBM traffic + weight VMEM,
    #     2-4x MXU rate; epilogue stays f32) ---
    w1_b, b1_b, w2_b, b2_b = prepare_params(w1, b1, w2, b2, dtype=jnp.bfloat16)
    out_bf16 = residual_layer(x.astype(jnp.bfloat16), w1_b, b1_b, w2_b, b2_b)
    jax.block_until_ready(out_bf16)
    assert out_bf16.shape == (batch, width)
    assert jnp.allclose(out_bf16.astype(jnp.float32), ref, atol=1e-1, rtol=1e-1)

    print("KERNEL_OK")
</pallas_src>

<mosaic_0001>
module attributes {stable_mosaic.version = 11 : i64} {
  func.func @residual_layer_kernel(%arg0: i32, %arg1: memref<24x128xf32, #tpu.memory_space<vmem>>, %arg2: memref<128x128xf32, #tpu.memory_space<vmem>>, %arg3: memref<1x128xf32, #tpu.memory_space<vmem>>, %arg4: memref<128x128xf32, #tpu.memory_space<vmem>>, %arg5: memref<1x128xf32, #tpu.memory_space<vmem>>, %arg6: memref<24x128xf32, #tpu.memory_space<vmem>>) attributes {dimension_semantics = [#tpu.dimension_semantics<parallel>], iteration_bounds = array<i64: 2>, scalar_prefetch = 0 : i64, scratch_operands = 0 : i64, tpu.core_type = #tpu.core_type<tc>, window_params = [{transform_indices = @transform_0, window_bounds = array<i64: 24, 128>}, {pipeline_mode = #tpu.pipeline_mode<synchronous>, transform_indices = @transform_1, window_bounds = array<i64: 128, 128>}, {pipeline_mode = #tpu.pipeline_mode<synchronous>, transform_indices = @transform_2, window_bounds = array<i64: 1, 128>}, {pipeline_mode = #tpu.pipeline_mode<synchronous>, transform_indices = @transform_3, window_bounds = array<i64: 128, 128>}, {pipeline_mode = #tpu.pipeline_mode<synchronous>, transform_indices = @transform_4, window_bounds = array<i64: 1, 128>}, {transform_indices = @transform_5, window_bounds = array<i64: 24, 128>}]} {
    %c0 = arith.constant 0 : index
    %c0_0 = arith.constant 0 : index
    %0 = vector.load %arg1[%c0, %c0_0] : memref<24x128xf32, #tpu.memory_space<vmem>>, vector<24x128xf32>
    %c0_1 = arith.constant 0 : index
    %c0_2 = arith.constant 0 : index
    %1 = vector.load %arg2[%c0_1, %c0_2] : memref<128x128xf32, #tpu.memory_space<vmem>>, vector<128x128xf32>
    %cst = arith.constant dense<0.000000e+00> : vector<24x128xf32>
    %2 = tpu.matmul %0, %1, %cst {dimension_numbers = #tpu.dot_dimension_numbers<[1], [0], [0], [1], [0, 0, 1, 1], [], []>} : vector<24x128xf32>, vector<128x128xf32>, vector<24x128xf32> -> vector<24x128xf32>
    %c0_3 = arith.constant 0 : index
    %c0_4 = arith.constant 0 : index
    %3 = vector.load %arg3[%c0_3, %c0_4] : memref<1x128xf32, #tpu.memory_space<vmem>>, vector<1x128xf32>
    %4 = vector.broadcast %3 : vector<1x128xf32> to vector<24x128xf32>
    %5 = arith.addf %2, %4 : vector<24x128xf32>
    %cst_5 = arith.constant 0.000000e+00 : f32
    %6 = vector.broadcast %cst_5 : f32 to vector<24x128xf32>
    %7 = arith.maximumf %5, %6 : vector<24x128xf32>
    %c0_6 = arith.constant 0 : index
    %c0_7 = arith.constant 0 : index
    %8 = vector.load %arg4[%c0_6, %c0_7] : memref<128x128xf32, #tpu.memory_space<vmem>>, vector<128x128xf32>
    %cst_8 = arith.constant dense<0.000000e+00> : vector<24x128xf32>
    %9 = tpu.matmul %7, %8, %cst_8 {dimension_numbers = #tpu.dot_dimension_numbers<[1], [0], [0], [1], [0, 0, 1, 1], [], []>} : vector<24x128xf32>, vector<128x128xf32>, vector<24x128xf32> -> vector<24x128xf32>
    %c0_9 = arith.constant 0 : index
    %c0_10 = arith.constant 0 : index
    %10 = vector.load %arg5[%c0_9, %c0_10] : memref<1x128xf32, #tpu.memory_space<vmem>>, vector<1x128xf32>
    %11 = vector.broadcast %10 : vector<1x128xf32> to vector<24x128xf32>
    %12 = arith.addf %9, %11 : vector<24x128xf32>
    %13 = arith.addf %12, %0 : vector<24x128xf32>
    %cst_11 = arith.constant 0.000000e+00 : f32
    %14 = vector.broadcast %cst_11 : f32 to vector<24x128xf32>
    %15 = arith.maximumf %13, %14 : vector<24x128xf32>
    %c0_12 = arith.constant 0 : index
    %c0_13 = arith.constant 0 : index
    %16 = vector.load %arg6[%c0_12, %c0_13] : memref<24x128xf32, #tpu.memory_space<vmem>>, vector<24x128xf32>
    tpu.vector_store %arg6[%c0_12, %c0_13], %15 {strides = array<i32>} : memref<24x128xf32, #tpu.memory_space<vmem>>, vector<24x128xf32>,
    return
  }
  func.func @transform_0(%arg0: i32) -> (i32, i32) {
    %c0_i32 = arith.constant 0 : i32
    %c0_i32_0 = arith.constant 0 : i32
    return %arg0, %c0_i32 : i32, i32
  }
  func.func @transform_1(%arg0: i32) -> (i32, i32) {
    %c0_i32 = arith.constant 0 : i32
    %c0_i32_0 = arith.constant 0 : i32
    %c0_i32_1 = arith.constant 0 : i32
    return %c0_i32, %c0_i32_0 : i32, i32
  }
  func.func @transform_2(%arg0: i32) -> (i32, i32) {
    %c0_i32 = arith.constant 0 : i32
    %c0_i32_0 = arith.constant 0 : i32
    %c0_i32_1 = arith.constant 0 : i32
    return %c0_i32, %c0_i32_0 : i32, i32
  }
  func.func @transform_3(%arg0: i32) -> (i32, i32) {
    %c0_i32 = arith.constant 0 : i32
    %c0_i32_0 = arith.constant 0 : i32
    %c0_i32_1 = arith.constant 0 : i32
    return %c0_i32, %c0_i32_0 : i32, i32
  }
  func.func @transform_4(%arg0: i32) -> (i32, i32) {
    %c0_i32 = arith.constant 0 : i32
    %c0_i32_0 = arith.constant 0 : i32
    %c0_i32_1 = arith.constant 0 : i32
    return %c0_i32, %c0_i32_0 : i32, i32
  }
  func.func @transform_5(%arg0: i32) -> (i32, i32) {
    %c0_i32 = arith.constant 0 : i32
    %c0_i32_0 = arith.constant 0 : i32
    return %arg0, %c0_i32 : i32, i32
  }
}

</mosaic_0001>

<bundles_post_ra>
// kernel: tpu_custom_call.1
= control target key start
LH: loop header
LB: loop body
LE: loop exit
PB: predicated region body
PF: predicated region fallthrough
CT: control target
= control target key end

     0   :  { %10 = vsyncpa [#allocation3], 0  ;;  %s1346_s0 = inlined_call_operand.hbm [shape: f32[44,128], index: 0, kind: input, shape index: {}]   ;;  %s1347_s1 = inlined_call_operand.hbm [shape: f32[128,128], index: 1, kind: input, shape index: {}]   ;;  %s1348_s2 = inlined_call_operand.vmem [shape: f32[1,128], index: 2, kind: input, shape index: {}]   ;;  %s1349_s3 = inlined_call_operand.hbm [shape: f32[128,128], index: 3, kind: input, shape index: {}]   ;;  %s1350_s4 = inlined_call_operand.vmem [shape: f32[1,128], index: 4, kind: input, shape index: {}]   ;;  %s1351_s5 = inlined_call_operand.hbm [shape: f32[44,128], index: 5, kind: output, shape index: {}]  }
   0x1   :  { %12 = vsyncpa [#allocation3 + $0x1], 0 }
   0x2   :  { %13 = vsyncpa [#allocation6], 0 }
   0x3   :  { %14 = vsyncpa [#allocation4], 0 }
   0x4   :  { %16 = vsyncpa [#allocation4 + $0x1], 0  ;;  %s1060_s18 = smov 0   ;;  %s1062_s19 = smov 0  }
   0x5   :  { %s1064_s20 = smov 0   ;;  %s1066_s21 = smov 0  }
   0x6 LB: > { %s1081_s22 = sadd.s32 4294967295, %s1017_s21   ;;  %s601_s23 = sadd.s32 4294967294, %s1017_s21   ;;  %s1017_s21 = sphi %s1066_s21, %s1373_s21   ;;  %s1013_s20 = sphi %s1064_s20, %s1372_s20   ;;  %s1009_s19 = sphi %s1062_s19, %s1371_s19   ;;  %s1005_s18 = sphi %s1060_s18, %s1370_s18  }
   0x7   : > { %p42_p0 = scmp.ne.s32.totalorder %s1009_s19, %s1005_s18  ;;  %p1352_p1 = scmp.eq.s32.totalorder %s1081_s22, 0 }
   0x8   : > { %p156_p3 = scmp.eq.s32.totalorder %s601_s23, 1  ;;  %p602_p5 = scmp.ge.s32.totalorder %s1017_s21, 1 }
   0x9   : > { %p1090_p4 = por %p1352_p1, %p42_p0  ;;  %p163_p7 = scmp.lt.s32.totalorder %s1017_s21, 3 }
   0xa   : > { %p1095_p6 = por %p156_p3, %p42_p0  ;;  %s1019_s27 = smov [#allocation5]  }
   0xb   : > { %s1356_s24 = scalar_select %p1090_p4, 1, 0 }
   0xc   : > { %s1357_s25 = scalar_select %p1095_p6, 1, 0 }
   0xd   : > { %p1100_p8 = pnand %p602_p5, %p163_p7  ;;  %s175_s28 = sshll.u32 %s1019_s27, 4  ;;  %s1104_s28 = int_to_ptr.vmem [resolvable:$true] %s175_s28 }
   0xe   : > { %s1020_s30 = smov [#allocation7]   ;;  %s861_s9 = scalar_lea.hbm %s1347_s1, 2048 }
   0xf   : > { %p799_p9 = pneg %p1100_p8  ;;  %s191_s6 = sshll.u32 %s1020_s30, 4  ;;  %s1115_s6 = int_to_ptr.vmem [resolvable:$true] %s191_s6 }
  0x10   : > { %p862_p12 = scmp.ne.s32.totalorder %s1347_s1, %s861_s9  ;;  %p868_p5 = scmp.lt.u32.totalorder %s861_s9, %s1347_s1 }
  0x11   : > { %p1111_p11 = pnand %p799_p9, %p1352_p1 }
  0x13   : > { %p863_p13 = pneg %p1111_p11 }
  0x15   : > { %p864_p0 = pnand %p863_p13, %p862_p12 }
  0x17   : > { %p865_p3 = pneg %p864_p0 }
  0x19   : > { %p870_p7 = pnand %p868_p5, %p865_p3 }
  0x1b   : > { %873 = shalt.err (!%p870_p7)
}
  0x1c   : > { %s874_s14 = scalar_lea.vmem %s1104_s28, 2048  ;;  %p882_p2 = scmp.lt.s32.totalorder %s1104_s28, %s1104_s28 }
  0x1d   : > { %p875_p9 = scmp.ne.s32.totalorder %s1104_s28, %s874_s14  ;;  %p883_p12 = scmp.lt.s32.totalorder %s874_s14, %s874_s14 }
  0x1f   : > { %p877_p10 = pnand %p875_p9, %p863_p13  ;;  %p884_p0 = por %p883_p12, %p882_p2 }
  0x21   : > { %p878_p1 = pneg %p877_p10 }
  0x23   : > { %p885_p6 = pnand %p884_p0, %p878_p1 }
  0x25   : > { %888 = shalt.err (!%p885_p6)
}
  0x26   : > { %s1353_s15 = smov 128   ;;  %s1022_s16 = smov 8  }
  0x27   : > { %802 = dma.hbm_to_vmem [thread:$0]  (!%p1111_p11), %s1347_s1, 2048, %s1104_s28, [#allocation6], %s1353_s15, %s1353_s15, %s1022_s16  }
  0x28   : > { %s889_s7 = scalar_lea.hbm %s1349_s3, 2048 }
  0x29   : > { %p890_p1 = scmp.ne.s32.totalorder %s1349_s3, %s889_s7  ;;  %p896_p10 = scmp.lt.u32.totalorder %s889_s7, %s1349_s3 }
  0x2b   : > { %p892_p2 = pnand %p890_p1, %p863_p13 }
  0x2d   : > { %p893_p6 = pneg %p892_p2 }
  0x2f   : > { %p898_p3 = pnand %p896_p10, %p893_p6 }
  0x31   : > { %901 = shalt.err (!%p898_p3)
}
  0x32   : > { %s902_s28 = scalar_lea.vmem %s1115_s6, 2048  ;;  %p910_p12 = scmp.lt.s32.totalorder %s1115_s6, %s1115_s6 }
  0x33   : > { %p903_p5 = scmp.ne.s32.totalorder %s1115_s6, %s902_s28  ;;  %p911_p0 = scmp.lt.s32.totalorder %s902_s28, %s902_s28 }
  0x35   : > { %p905_p7 = pnand %p903_p5, %p863_p13  ;;  %p912_p1 = por %p911_p0, %p910_p12 }
  0x37   : > { %p906_p9 = pneg %p905_p7 }
  0x39   : > { %p913_p2 = pnand %p912_p1, %p906_p9 }
  0x3b   : > { %916 = shalt.err (!%p913_p2)
}
  0x3c   : > { %805 = dma.hbm_to_vmem [thread:$0]  (!%p1111_p11), %s1349_s3, 2048, %s1115_s6, [#allocation6], %s1353_s15, %s1353_s15, %s1022_s16  }
  0x3d   : > { %s1176_s29 = sadd.s32 1, %s1017_s21   ;;  %s29_s14 = sadd.s32 1, %s1013_s20 }
  0x3e   : > { %s26_s17 = ssub.s32 %s1017_s21, %s1176_s29  ;;  %p36_p13 = scmp.ne.s32.totalorder %s1013_s20, %s1009_s19 }
  0x3f   : > { %p27_p6 = scmp.eq.s32.totalorder %s26_s17, 0  ;;  %p37_p10 = scmp.eq.s32.totalorder %s1017_s21, 0 }
  0x40   : > { %p1360_p3 = scmp.eq.s32.totalorder %s1081_s22, 1  ;;  %p816_p7 = scmp.lt.s32.totalorder %s1017_s21, 2 }
  0x41   : > { %s1192_s27 = scalar_select %p27_p6, %s1013_s20, %s29_s14  }
  0x42   : > { %p1186_p5 = por %p1360_p3, %p36_p13  ;;  %p38_p9 = por %p37_p10, %p36_p13 }
  0x43   : > { %s208_s30 = sand.u32 1, %s1013_s20   ;;  %s615_s6 = smul.u32 384, %s1017_s21 }
  0x44   : > { %s1361_s23 = scalar_select %p1186_p5, 1, 0 }
  0x45   : > { %s785_s7 = smul.u32 24, %s208_s30  ;;  %p1196_p11 = pnand %p816_p7, %p38_p9 }
  0x46   : > { %s1203_s11 = scalar_lea.hbm %s1346_s0, %s615_s6  ;;  %s1207_s13 = scalar_lea.sflag [#allocation3], %s208_s30 }
  0x47   : > { %s212_s28 = scalar_lea.vmem [#allocation2], %s785_s7  ;;  %s917_s14 = scalar_lea.hbm %s1203_s11, 384 }
  0x48   : > { %s219_s12 = sshll.u32 %s212_s28, 4  ;;  %p918_p12 = scmp.ne.s32.totalorder %s1203_s11, %s917_s14  ;;  %s1205_s12 = int_to_ptr.vmem [resolvable:$true] %s219_s12 }
  0x49   : > { %p919_p0 = pneg %p1196_p11  ;;  %s922_s9 = scalar_lea.hbm %s1346_s0, 768 }
  0x4a   : > { %p923_p13 = scmp.lt.u32.totalorder %s1203_s11, %s1346_s0  ;;  %p924_p6 = scmp.lt.u32.totalorder %s922_s9, %s917_s14 }
  0x4b   : > { %p920_p1 = pnand %p919_p0, %p918_p12  ;;  %p926_p3 = scmp.lt.u32.totalorder %s917_s14, %s1203_s11 }
  0x4c   : > { %p925_p10 = por %p924_p6, %p923_p13 }
  0x4d   : > { %p921_p2 = pneg %p920_p1 }
  0x4e   : > { %p927_p7 = por %p926_p3, %p925_p10 }
  0x50   : > { %p928_p9 = pnand %p927_p7, %p921_p2 }
  0x52   : > { %931 = shalt.err (!%p928_p9)
}
  0x53   : > { %s932_s30 = scalar_lea.vmem %s1205_s12, 384  ;;  %s1023_s7 = smov [#allocation2]  }
  0x54   : > { %p933_p12 = scmp.ne.s32.totalorder %s1205_s12, %s932_s30  ;;  %s937_s28 = sshll.u32 %s1023_s7, 4  ;;  %s938_s28 = int_to_ptr.vmem [resolvable:$false] %s937_s28 }
  0x55   : > { %s939_s15 = scalar_lea.vmem %s938_s28, 768  ;;  %p940_p4 = scmp.lt.s32.totalorder %s1205_s12, %s938_s28 }
  0x56   : > { %p935_p1 = pnand %p933_p12, %p919_p0  ;;  %p941_p13 = scmp.lt.s32.totalorder %s939_s15, %s932_s30 }
  0x58   : > { %p936_p5 = pneg %p935_p1  ;;  %p942_p6 = por %p941_p13, %p940_p4 }
  0x5a   : > { %p943_p10 = pnand %p942_p6, %p936_p5 }
  0x5c   : > { %946 = shalt.err (!%p943_p10)
}
  0x5d   : > { %s1363_s14 = smov 128   ;;  %231 = sbr.rel (%p1100_p8) target bundleno = 595 (0x253), region = 40 }
  0x5e   : > { %809 = dma.hbm_to_vmem [thread:$0]  (!%p1196_p11), %s1203_s11, 384, %s1205_s12, %s1207_s13, %s1363_s14, %s1363_s14, %s1022_s16  }
  0x5f   : > { %s1241_s17 = sand.u32 (!%p1100_p8), 1, %s1009_s19   ;;  %p1364_p4 = scmp.ne.s32.totalorder (!%p1100_p8), %s1356_s24, 0 }
  0x60   : > { %s786_s6 = smul.u32 (!%p1100_p8), 24, %s1241_s17  ;;  %s234_s9 = scalar_lea.sflag (!%p1100_p8), [#allocation3], %s1241_s17 }
  0x62   : > { %s1247_s8 = scalar_lea.vmem (!%p1100_p8), [#allocation2], %s786_s6 }
  0x64   : > { %992 = dma.done.wait (%p1364_p4), %s234_s9, 384  }
  0x65   : > { %994 = vsyncadd (%p1364_p4), %s234_s9, 4294966912  ;;  %p1365_p5 = scmp.eq.s32.totalorder %s1081_s22, 0 }
  0x67   : > { %996 = dma.done.wait (%p1365_p5), [#allocation6], 4096   ;;  %p1366_p8 = pmov %p1365_p5 }
  0x68   : > { %v1024_v0 = vmov 0.0|0.0   ;;  %vm1025_vm0 = vmmov 0   ;;  %v1026_v1 = vmov 0.0   ;;  %v277_v2 = vld [vmem:[#allocation5] sm:$0xff]  ;;  %v278_v3 = vld [vmem:[#allocation5 + $0x8] sm:$0xff]  ;;  %v279_v4 = vld [vmem:[#allocation5 + $0x10] sm:$0xff] }
  0x69   : > { %998 = vsyncadd (%p1366_p8), [#allocation6], 4294963200  ;;  %737 = vmatprep.subr.bf16.mxu0 %v1024_v0  ;;  %687 = vmatprep.mubr.msk.f32.mxu0 %vm1025_vm0, %v1026_v1  ;;  %v738_v5 = vpack.c.bf16 %v278_v3, %v277_v2  ;;  %v280_v6 = vld [vmem:[#allocation5 + $0x18] sm:$0xff]  ;;  %v281_v8 = vld [vmem:[#allocation5 + $0x20] sm:$0xff]  ;;  %s271_s12 = scalar_lea.vmem [#allocation8], %s786_s6  ;;  %s616_s10 = smul.u32 384, %s1081_s22 }
  0x6a   : > { %761 = vmatprep.subr.bf16.mxu1 %v1024_v0  ;;  %728 = vmatprep.mubr.msk.f32.mxu1 %vm1025_vm0, %v1026_v1  ;;  %v741_v7 = vpack.c.bf16 %v280_v6, %v279_v4  ;;  %v282_v9 = vld [vmem:[#allocation5 + $0x28] sm:$0xff]  ;;  %v383_v10 = vld [vmem:[#allocation7] sm:$0xff]  ;;  %v385_v14 = vld [vmem:[#allocation7 + $0x10] sm:$0xff]  ;;  %s509_s13 = sshll.u32 %s271_s12, 4  ;;  %s496_s15 = scalar_lea.sflag [#allocation4], %s1241_s17  ;;  %s1297_s13 = int_to_ptr.vmem [resolvable:$true] %s509_s13 }
  0x6b   : > { %739 = vmatpush3.bf16.msra.mxu0 %v738_v5  ;;  %v384_v11 = vld [vmem:[#allocation7 + $0x8] sm:$0xff]  ;;  %v744_v12 = vpack.c.bf16 %v282_v9, %v281_v8  ;;  %v386_v15 = vld [vmem:[#allocation7 + $0x18] sm:$0xff]  ;;  %v283_v16 = vld [vmem:[#allocation5 + $0x30] sm:$0xff]  ;;  %s1302_s28 = scalar_lea.hbm %s1351_s5, %s616_s10  ;;  %s947_s14 = scalar_lea.vmem %s1297_s13, 384 }
  0x6c   : > { %740 = vmatprep.subr.bf16.mxu0 %v1024_v0  ;;  %v762_v13 = vpack.c.bf16 %v384_v11, %v383_v10  ;;  %v284_v17 = vld [vmem:[#allocation5 + $0x38] sm:$0xff]  ;;  %v765_v18 = vpack.c.bf16 %v386_v15, %v385_v14  ;;  %v387_v19 = vld [vmem:[#allocation7 + $0x20] sm:$0xff]  ;;  %v388_v20 = vld [vmem:[#allocation7 + $0x28] sm:$0xff]  ;;  %p948_p11 = scmp.ne.s32.totalorder %s1297_s13, %s947_s14  ;;  %p1367_p0 = scmp.ne.s32.totalorder %s1361_s23, 0 }
  0x6d   : > { %v747_v21 = vpack.c.bf16 %v284_v17, %v283_v16  ;;  %v285_v22 = vld [vmem:[#allocation5 + $0x40] sm:$0xff]  ;;  %v286_v23 = vld [vmem:[#allocation5 + $0x48] sm:$0xff]  ;;  %v768_v24 = vpack.c.bf16 %v388_v20, %v387_v19  ;;  %v389_v25 = vld [vmem:[#allocation7 + $0x30] sm:$0xff]  ;;  %s1027_s22 = smov [#allocation8]  }
  0x6e   : > { %763 = vmatpush3.bf16.msra.mxu1 %v762_v13  ;;  %v390_v26 = vld [vmem:[#allocation7 + $0x38] sm:$0xff]  ;;  %v750_v27 = vpack.c.bf16 %v286_v23, %v285_v22  ;;  %v287_v28 = vld [vmem:[#allocation5 + $0x50] sm:$0xff]  ;;  %v391_v31 = vld [vmem:[#allocation7 + $0x40] sm:$0xff]  ;;  %p949_p2 = pnand %p948_p11, %p1367_p0  ;;  %s951_s6 = sshll.u32 %s1027_s22, 4  ;;  %s952_s6 = int_to_ptr.vmem [resolvable:$false] %s951_s6 }
  0x6f   : > { %742 = vmatpush3.bf16.msra.mxu0 %v741_v7  ;;  %764 = vmatprep.subr.bf16.mxu1 %v1024_v0  ;;  %v288_v29 = vld [vmem:[#allocation5 + $0x58] sm:$0xff]  ;;  %v771_v30 = vpack.c.bf16 %v390_v26, %v389_v25  ;;  %v392_v32 = vld [vmem:[#allocation7 + $0x48] sm:$0xff]  ;;  %v289_v34 = vld [vmem:[#allocation5 + $0x60] sm:$0xff]  ;;  %s953_s9 = scalar_lea.vmem %s952_s6, 768  ;;  %p954_p7 = scmp.lt.s32.totalorder %s1297_s13, %s952_s6 }
  0x70   : > { %743 = vmatprep.subr.bf16.mxu0 %v1024_v0  ;;  %v753_v33 = vpack.c.bf16 %v288_v29, %v287_v28  ;;  %v290_v35 = vld [vmem:[#allocation5 + $0x68] sm:$0xff]  ;;  %v774_v36 = vpack.c.bf16 %v392_v32, %v391_v31  ;;  %v393_v37 = vld [vmem:[#allocation7 + $0x50] sm:$0xff]  ;;  %v394_v38 = vld [vmem:[#allocation7 + $0x58] sm:$0xff]  ;;  %p950_p3 = pneg %p949_p2  ;;  %p955_p9 = scmp.lt.s32.totalorder %s953_s9, %s947_s14 }
  0x71   : > { %v756_v39 = vpack.c.bf16 %v290_v35, %v289_v34  ;;  %v291_v40 = vld [vmem:[#allocation5 + $0x70] sm:$0xff]  ;;  %v292_v41 = vld [vmem:[#allocation5 + $0x78] sm:$0xff]  ;;  %v777_v42 = vpack.c.bf16 %v394_v38, %v393_v37  ;;  %v395_v43 = vld [vmem:[#allocation7 + $0x60] sm:$0xff] }
  0x72   : > { %766 = vmatpush3.bf16.msra.mxu1 %v765_v18  ;;  %v396_v44 = vld [vmem:[#allocation7 + $0x68] sm:$0xff]  ;;  %v759_v45 = vpack.c.bf16 %v292_v41, %v291_v40  ;;  %v275_v48 = vld [vmem:[%s1247_s8 + $0x8] sm:$0xff]  ;;  %v276_v49 = vld [vmem:[%s1247_s8 + $0x10] sm:$0xff]  ;;  %p956_p12 = por %p955_p9, %p954_p7 }
  0x73   : > { %745 = vmatpush3.bf16.msra.mxu0 %v744_v12  ;;  %767 = vmatprep.subr.bf16.mxu1 %v1024_v0  ;;  %v780_v46 = vpack.c.bf16 %v396_v44, %v395_v43  ;;  %v274_v47 = vld [vmem:[%s1247_s8] sm:$0xff]  ;;  %v398_v51 = vld [vmem:[#allocation7 + $0x78] sm:$0xff] }
  0x74   : > { %746 = vmatprep.subr.bf16.mxu0 %v1024_v0  ;;  %v397_v50 = vld [vmem:[#allocation7 + $0x70] sm:$0xff]  ;;  %p957_p1 = pnand %p956_p12, %p950_p3 }
  0x75   : > { %v783_v52 = vpack.c.bf16 %v398_v51, %v397_v50  ;;  %v610_v53 = vld [vmem:[%s1348_s2] ss:$0 sm:$0xff] }
  0x76   : > { %769 = vmatpush3.bf16.msra.mxu1 %v768_v24  ;;  %v611_v3 = vld [vmem:[%s1350_s4] ss:$0 sm:$0xff] }
  0x77   : > { %748 = vmatpush3.bf16.msra.mxu0 %v747_v21  ;;  %770 = vmatprep.subr.bf16.mxu1 %v1024_v0 }
  0x78   : > { %749 = vmatprep.subr.bf16.mxu0 %v1024_v0 }
  0x7a   : > { %772 = vmatpush3.bf16.msra.mxu1 %v771_v30 }
  0x7b   : > { %751 = vmatpush3.bf16.msra.mxu0 %v750_v27  ;;  %773 = vmatprep.subr.bf16.mxu1 %v1024_v0 }
  0x7c   : > { %752 = vmatprep.subr.bf16.mxu0 %v1024_v0 }
  0x7e   : > { %775 = vmatpush3.bf16.msra.mxu1 %v774_v36 }
  0x7f   : > { %754 = vmatpush3.bf16.msra.mxu0 %v753_v33  ;;  %776 = vmatprep.subr.bf16.mxu1 %v1024_v0 }
  0x80   : > { %755 = vmatprep.subr.bf16.mxu0 %v1024_v0 }
  0x82   : > { %778 = vmatpush3.bf16.msra.mxu1 %v777_v42 }
  0x83   : > { %757 = vmatpush3.bf16.msra.mxu0 %v756_v39  ;;  %779 = vmatprep.subr.bf16.mxu1 %v1024_v0 }
  0x84   : > { %758 = vmatprep.subr.bf16.mxu0 %v1024_v0 }
  0x86   : > { %781 = vmatpush3.bf16.msra.mxu1 %v780_v46 }
  0x87   : > { %760 = vmatpush3.bf16.msra.mxu0 %v759_v45  ;;  %782 = vmatprep.subr.bf16.mxu1 %v1024_v0 }
  0x8a   : > { %688 = vmatmul.mubr.f32.vlgmr.msra.gmra.mrb[0].mxu0 %v274_v47  ;;  %784 = vmatpush3.bf16.msra.mxu1 %v783_v52 }
  0x8b   : > { %690 = vmatprep.mubr.msk.f32.mxu0 %vm1025_vm0, %v1026_v1 }
  0x8e   : > { %691 = vmatmul.mubr.f32.gmra.mrb[2].mxu0 %v275_v48 }
  0x8f   : > { %693 = vmatprep.mubr.msk.f32.mxu0 %vm1025_vm0, %v1026_v1 }
  0x92   : > { %694 = vmatmul.mubr.f32.gmra.mrb[4].mxu0 %v276_v49 }
 0x15d   : > { %v366_v54 = vpop.f32.mrb[0].mxu0 }
 0x15e   : > { %v367_v55 = vadd.f32 %v610_v53, %v366_v54  ;;  %v689_v56 = vpop.f32.mrb[1].mxu0 }
 0x160   : > { %v380_v57 = vmax.f32 %v367_v55, 0.0 }
 0x161   : > { %v371_v58 = vpop.f32.mrb[2].mxu0 }
 0x162   : > { %v372_v59 = vadd.f32 %v610_v53, %v371_v58  ;;  %v692_v60 = vpop.f32.mrb[3].mxu0  ;;  %729 = vmatmul.mubr.f32.vlgmr.msra.gmra.mrb[0].mxu1 %v380_v57 }
 0x163   : > { %731 = vmatprep.mubr.msk.f32.mxu1 %vm1025_vm0, %v1026_v1 }
 0x164   : > { %v381_v61 = vmax.f32 %v372_v59, 0.0 }
 0x165   : > { %v376_v62 = vpop.f32.mrb[4].mxu0 }
 0x166   : > { %v377_v63 = vadd.f32 %v610_v53, %v376_v62  ;;  %v695_v0 = vpop.f32.mrb[5].mxu0  ;;  %732 = vmatmul.mubr.f32.gmra.mrb[2].mxu1 %v381_v61 }
 0x167   : > { %734 = vmatprep.mubr.msk.f32.mxu1 %vm1025_vm0, %v1026_v1 }
 0x168   : > { %v382_v2 = vmax.f32 %v377_v63, 0.0 }
 0x16a   : > { %735 = vmatmul.mubr.f32.gmra.mrb[4].mxu1 %v382_v2 }
 0x235   : > { %v472_v4 = vpop.f32.mrb[0].mxu1 }
 0x236   : > { %v473_v5 = vadd.f32 %v611_v3, %v472_v4  ;;  %v730_v6 = vpop.f32.mrb[1].mxu1 }
 0x238   : > { %v486_v7 = vadd.f32 %v473_v5, %v274_v47 }
 0x239   : > { %v477_v8 = vpop.f32.mrb[2].mxu1 }
 0x23a   : > { %v489_v9 = vmax.f32 %v486_v7, 0.0  ;;  %v478_v10 = vadd.f32 %v611_v3, %v477_v8  ;;  %v733_v11 = vpop.f32.mrb[3].mxu1 }
 0x23c   : > { %492 = vst [vmem:[%s271_s12] sm:$0xff] %v489_v9  ;;  %v487_v1 = vadd.f32 %v478_v10, %v275_v48 }
 0x23d   : > { %v482_v12 = vpop.f32.mrb[4].mxu1 }
 0x23e   : > { %v490_v13 = vmax.f32 %v487_v1, 0.0  ;;  %v483_v14 = vadd.f32 %v611_v3, %v482_v12  ;;  %v736_v15 = vpop.f32.mrb[5].mxu1 }
 0x240   : > { %493 = vst [vmem:[%s271_s12 + $0x8] sm:$0xff] %v490_v13  ;;  %v488_v16 = vadd.f32 %v483_v14, %v276_v49 }
 0x242   : > { %v491_v17 = vmax.f32 %v488_v16, 0.0 }
 0x244   : > { %494 = vst [vmem:[%s271_s12 + $0x10] sm:$0xff] %v491_v17 }
 0x245   : > { %960 = shalt.err (!%p957_p1)
}
 0x246   : > { %s961_s8 = scalar_lea.hbm %s1302_s28, 384  ;;  %s965_s16 = scalar_lea.hbm %s1351_s5, 768 }
 0x247   : > { %p962_p13 = scmp.ne.s32.totalorder %s1302_s28, %s961_s8  ;;  %p966_p4 = scmp.lt.u32.totalorder %s1302_s28, %s1351_s5 }
 0x248   : > { %p967_p5 = scmp.lt.u32.totalorder %s965_s16, %s961_s8  ;;  %p969_p11 = scmp.lt.u32.totalorder %s961_s8, %s1302_s28 }
 0x249   : > { %p963_p6 = pnand %p962_p13, %p1367_p0 }
 0x24a   : > { %p968_p8 = por %p967_p5, %p966_p4 }
 0x24b   : > { %p964_p10 = pneg %p963_p6 }
 0x24c   : > { %p970_p2 = por %p969_p11, %p968_p8 }
 0x24e   : > { %p971_p3 = pnand %p970_p2, %p964_p10 }
 0x250   : > { %974 = shalt.err (!%p971_p3)
}
 0x251   : > { %s1028_s10 = smov 128   ;;  %s1029_s30 = smov 8  }
 0x252   : > { %797 = dma.vmem_to_hbm [thread:$0]  (%p1367_p0), %s1297_s13, 384, %s1302_s28, %s496_s15, %s1028_s10, %s1028_s10, %s1029_s30  }
 0x253 PF: > { %s524_s7 = sand.u32 1, %s1005_s18   ;;  %p1368_p7 = scmp.ne.s32.totalorder %s1357_s25, 0 }
 0x254   : > { %p1369_p9 = scmp.ge.s32.totalorder %s1017_s21, 2  ;;  %s525_s14 = scalar_lea.sflag [#allocation4], %s524_s7 }
 0x256   : > { %p811_p12 = pnand %p1369_p9, %p1368_p7 }
 0x258   : > { %1000 = dma.done.wait (!%p811_p12), %s525_s14, 384  }
 0x259   : > { %1002 = vsyncadd (!%p811_p12), %s525_s14, 4294966912  ;;  %p19_p1 = scmp.ge.s32.totalorder %s1176_s29, 4   ;;  %s1370_s18 = smov %s1009_s19 }
 0x25a   : > { %s1371_s19 = smov %s1013_s20  ;;  %s1372_s20 = smov %s1192_s27 }
 0x25b   : > { %s1373_s21 = smov %s1176_s29  ;;  %21 = sbr.rel (!%p19_p1) target bundleno = 6 (0x6), region = 93 }
 0x262   :  { %530 = vsyncpa [#allocation3], 1 }
 0x263   :  { %532 = vsyncpa [#allocation3 + $0x1], 1 }
 0x264   :  { %533 = vsyncpa [#allocation6], 1 }
 0x265   :  { %534 = vsyncpa [#allocation4], 1 }
 0x266   :  { %536 = vsyncpa [#allocation4 + $0x1], 1 }

</bundles_post_ra>
